<compile_context>
chip_gen: v5e
topology: v5e:2x2
jax: 0.10.0
libtpu: 0.0.40
codegen_flags: <defaults>
</compile_context>

<pallas_src>
import functools

import jax
import jax.numpy as jnp
from jax import lax
from jax.experimental import pallas as pl
from jax.experimental.pallas import tpu as pltpu


# ---------------------------------------------------------------------------
# VMEM / tiling helpers
# ---------------------------------------------------------------------------

def _vmem_capacity_bytes():
    """Per-core VMEM capacity; conservative fallback (v7x per-TC) if query fails."""
    try:
        info = pltpu.get_tpu_info()
        for attr in ("vmem_capacity_bytes", "vmem_bytes", "vmem_size_bytes"):
            v = getattr(info, attr, None)
            if v:
                return int(v)
    except Exception:
        pass
    return 64 * 1024 * 1024


def _const_block_spec(shape):
    """BlockSpec for a grid-invariant operand.

    Single-buffered (pl.Buffered(1)) when pipeline_mode is supported: the block
    index never changes across grid steps, so double-buffering it only wastes VMEM.
    """
    index_map = lambda i, _nd=len(shape): (0,) * _nd
    if hasattr(pl, "Buffered"):
        try:
            return pl.BlockSpec(shape, index_map, pipeline_mode=pl.Buffered(1))
        except TypeError:
            pass
    return pl.BlockSpec(shape, index_map)


def _pick_seq_tile(L):
    """Sequence tile for the (embarrassingly parallel) QKV projection grid."""
    cands = [t for t in (512, 256, 128, 64, 32, 16, 8) if t <= L and L % t == 0]
    for t in cands:
        if L // t >= 2:               # >=2 steps so both v7x TCs get work
            return t
    return cands[0] if cands else L


def _pick_query_tile(L, D, heads, vmem_budget):
    """Largest query tile whose VMEM footprint fits the per-generation budget."""
    hd = D // heads

    def est_bytes(t):
        # Grid-invariant operands (counted double-buffered to stay conservative
        # even if pl.Buffered(1) is unavailable): K^T, V, Wo (head-major), bias.
        invariant = 2 * (2 * D * L + D * D + D)
        # Per-step pipelined blocks (double-buffered): Q tile, out tile, attn tile.
        per_step = 2 * (t * D) + 2 * (t * D) + 2 * (heads * t * L)
        # Rough in-kernel intermediates: energy+probs (H,t,L), batched out-proj
        # (H,t,D), per-head context (H,t,hd).
        interm = 2 * (heads * t * L) + heads * t * D + heads * t * hd
        return 4 * (invariant + per_step + interm)

    cands = [t for t in (512, 256, 128, 64, 32, 16, 8) if t <= L and L % t == 0]
    # Prefer >= 2 grid steps (v7x has two TensorCores) at the largest fitting tile.
    for t in cands:
        if L // t >= 2 and est_bytes(t) <= vmem_budget:
            return t
    for t in cands:
        if est_bytes(t) <= vmem_budget:
            return t
    return cands[-1] if cands else L


# ---------------------------------------------------------------------------
# Kernels
# ---------------------------------------------------------------------------

def qkv_proj_kernel(x_ref, wqkv_ref, qkv_ref, *, compute_dtype):
    """Fused QKV projection: one (tl, D) x (D, 3D) MXU matmul per sequence tile.
    The 1/sqrt(D) softmax scale is pre-folded into the Q columns by the wrapper."""
    qkv_ref[...] = jnp.dot(x_ref[...].astype(compute_dtype),
                           wqkv_ref[...].astype(compute_dtype),
                           preferred_element_type=jnp.float32)


def mha_attention_kernel(qh_ref, khT_ref, vh_ref, woh_ref, bo_ref,
                         out_ref, attn_ref, *, compute_dtype):
    heads, tq, hd = qh_ref.shape          # Q block: (H, TQ, hd), pre-scaled
    L = khT_ref.shape[-1]                 # K^T block: (H, hd, L)
    c = lambda a: a.astype(compute_dtype)

    # Batched per-head energy: (H, TQ, L).  Head-major layouts keep this a clean
    # batched MXU contraction with L as the lane/output minor dim.
    e = jnp.einsum('hqd,hdk->hqk', c(qh_ref[...]), c(khT_ref[...]),
                   preferred_element_type=jnp.float32)

    # Module mask, built once per tile and broadcast over heads:
    #   strictly above diagonal -> -inf ; diagonal -> forced 0.0 ; below kept.
    q0 = pl.program_id(0) * tq
    row = q0 + lax.broadcasted_iota(jnp.int32, (tq, L), 0)
    col = lax.broadcasted_iota(jnp.int32, (tq, L), 1)
    e = jnp.where(col > row, jnp.float32(-jnp.inf), e)
    e = jnp.where(col == row, jnp.float32(0.0), e)

    # Exact softmax over keys (1/sqrt(D) already folded into Q).  The attention
    # matrix is returned to the caller, so no approx reciprocal here.  The diagonal
    # is always 0.0, so no row is fully -inf (no NaN risk).
    m = jnp.max(e, axis=-1, keepdims=True)
    p = jnp.exp(e - m)
    attn = p / jnp.sum(p, axis=-1, keepdims=True)
    attn_ref[...] = attn                                    # (H, TQ, L) slab store

    # Per-head context, then fc_out fused as a batched-over-heads contraction and
    # reduced over H (avoids the (TQ, H, hd) -> (TQ, D) reshape/relayout for hd<128).
    ctx = jnp.einsum('hql,hld->hqd', c(attn), c(vh_ref[...]),
                     preferred_element_type=jnp.float32)     # (H, TQ, hd)
    proj = jnp.einsum('hqd,hdk->hqk', c(ctx), c(woh_ref[...]),
                      preferred_element_type=jnp.float32)    # (H, TQ, D)
    out_ref[...] = proj.sum(axis=0) + bo_ref[...]


# ---------------------------------------------------------------------------
# Wrapper
# ---------------------------------------------------------------------------

def multi_head_attention(x, wq_t, wk_t, wv_t, wo_t, bo, heads,
                         compute_dtype=jnp.float32):
    """x: (L, D) f32.  Weights pre-transposed to (in, out).  bo: (1, D).
    Returns (output (L, D), attention (H, L, L)) — matches the PyTorch forward.
    compute_dtype=jnp.bfloat16 recovers v6e/v7x MXU throughput (f32 accumulation
    kept); default f32 for numerical parity with the f32 module."""
    L, D = x.shape
    assert D % heads == 0, "input_size must be divisible by heads"
    hd = D // heads

    vmem_cap = _vmem_capacity_bytes()
    vmem_limit = min(int(vmem_cap * 0.9), 128 * 1024 * 1024)

    # ---- one-time weight prep (outside any grid loop) -------------------------
    inv_sqrt_d = 1.0 / jnp.sqrt(jnp.float32(D))
    wqkv = jnp.concatenate([wq_t * inv_sqrt_d, wk_t, wv_t], axis=1)   # (D, 3D)

    # ---- fused QKV projection: computed ONCE (not per query tile) -------------
    tl = _pick_seq_tile(L)
    qkv = pl.pallas_call(
        functools.partial(qkv_proj_kernel, compute_dtype=compute_dtype),
        grid=(L // tl,),
        in_specs=[
            pl.BlockSpec((tl, D), lambda i: (i, 0)),     # sequence rows of x
            _const_block_spec((D, 3 * D)),               # fused weight (grid-invariant)
        ],
        out_specs=pl.BlockSpec((tl, 3 * D), lambda i: (i, 0)),
        out_shape=jax.ShapeDtypeStruct((L, 3 * D), jnp.float32),
        compiler_params=pltpu.CompilerParams(
            dimension_semantics=("parallel",),
            vmem_limit_bytes=vmem_limit,
        ),
    )(x, wqkv)

    # Head-major layouts, built once in XLA (cheap, outside the attention grid):
    #   Q (H, L, hd) pre-scaled, K^T (H, hd, L), V (H, L, hd), Wo (H, hd, D).
    q, k, v = qkv[:, :D], qkv[:, D:2 * D], qkv[:, 2 * D:]
    qh = q.reshape(L, heads, hd).transpose(1, 0, 2)
    khT = k.reshape(L, heads, hd).transpose(1, 2, 0)
    vh = v.reshape(L, heads, hd).transpose(1, 0, 2)
    woh = wo_t.reshape(heads, hd, D)

    # ---- attention + fc_out, tiled over query rows -----------------------------
    tq = _pick_query_tile(L, D, heads, int(vmem_cap * 0.55))
    kernel = functools.partial(mha_attention_kernel, compute_dtype=compute_dtype)
    out, attn = pl.pallas_call(
        kernel,
        grid=(L // tq,),
        in_specs=[
            pl.BlockSpec((heads, tq, hd), lambda i: (0, i, 0)),   # Q rows for this tile
            _const_block_spec((heads, hd, L)),                    # K^T (grid-invariant)
            _const_block_spec((heads, L, hd)),                    # V   (grid-invariant)
            _const_block_spec((heads, hd, D)),                    # fc_out weight (head-major)
            _const_block_spec((1, D)),                            # fc_out bias
        ],
        out_specs=(
            pl.BlockSpec((tq, D), lambda i: (i, 0)),
            pl.BlockSpec((heads, tq, L), lambda i: (0, i, 0)),
        ),
        out_shape=(
            jax.ShapeDtypeStruct((L, D), jnp.float32),
            jax.ShapeDtypeStruct((heads, L, L), jnp.float32),
        ),
        compiler_params=pltpu.CompilerParams(
            dimension_semantics=("parallel",),     # query tiles split across v7x TCs
            vmem_limit_bytes=vmem_limit,
        ),
    )(qh, khT, vh, woh, bo)
    return out, attn


# ---------------------------------------------------------------------------
# Pure-JAX reference (transcription of the PyTorch forward) and self-test
# ---------------------------------------------------------------------------

def _reference(x, wq_t, wk_t, wv_t, wo_t, bo, heads):
    L, D = x.shape
    hd = D // heads
    q = x @ wq_t
    k = x @ wk_t
    v = x @ wv_t
    qh = q.reshape(L, heads, hd)
    kh = k.reshape(L, heads, hd)
    vh = v.reshape(L, heads, hd)
    e = jnp.einsum('qhd,khd->hqk', qh, kh)
    row = jnp.arange(L)[:, None]
    col = jnp.arange(L)[None, :]
    e = jnp.where(col > row, -jnp.inf, e)
    e = jnp.where(col == row, 0.0, e)
    a = jax.nn.softmax(e / jnp.sqrt(jnp.float32(D)), axis=2)
    ws = jnp.einsum('hql,lhd->qhd', a, vh).reshape(L, D)
    return ws @ wo_t + bo, a


if __name__ == "__main__":
    L, D, H = 8, 32, 4          # seq=8, input_size=32, heads=4 -> head_dim=8

    key = jax.random.PRNGKey(0)
    kx, kq, kk, kv, ko, kb = jax.random.split(key, 6)
    bound = 1.0 / (D ** 0.5)    # nn.Linear-style uniform bound, deterministic

    x = jax.random.normal(kx, (L, D), dtype=jnp.float32)
    wq_t = jax.random.uniform(kq, (D, D), jnp.float32, -bound, bound)
    wk_t = jax.random.uniform(kk, (D, D), jnp.float32, -bound, bound)
    wv_t = jax.random.uniform(kv, (D, D), jnp.float32, -bound, bound)
    wo_t = jax.random.uniform(ko, (D, D), jnp.float32, -bound, bound)
    bo = jax.random.uniform(kb, (1, D), jnp.float32, -bound, bound)

    out, attn = multi_head_attention(x, wq_t, wk_t, wv_t, wo_t, bo, H)
    out, attn = jax.block_until_ready((out, attn))

    ref_out, ref_attn = _reference(x, wq_t, wk_t, wv_t, wo_t, bo, H)
    assert out.shape == (L, D) and attn.shape == (H, L, L)
    assert jnp.allclose(out, ref_out, atol=2e-3, rtol=2e-3)
    assert jnp.allclose(attn, ref_attn, atol=1e-3, rtol=1e-3)

    print("KERNEL_OK")
</pallas_src>

<mosaic_0001>
module attributes {stable_mosaic.version = 11 : i64} {
  func.func @qkv_proj_kernel(%arg0: i32, %arg1: memref<8x32xf32, #tpu.memory_space<vmem>>, %arg2: memref<32x96xf32, #tpu.memory_space<vmem>>, %arg3: memref<8x96xf32, #tpu.memory_space<vmem>>) attributes {dimension_semantics = [#tpu.dimension_semantics<parallel>], iteration_bounds = array<i64: 1>, scalar_prefetch = 0 : i64, scratch_operands = 0 : i64, tpu.core_type = #tpu.core_type<tc>, window_params = [{transform_indices = @transform_0, window_bounds = array<i64: 8, 32>}, {pipeline_mode = #tpu.pipeline_mode<synchronous>, transform_indices = @transform_1, window_bounds = array<i64: 32, 96>}, {transform_indices = @transform_2, window_bounds = array<i64: 8, 96>}]} {
    %c0 = arith.constant 0 : index
    %c0_0 = arith.constant 0 : index
    %0 = vector.load %arg1[%c0, %c0_0] : memref<8x32xf32, #tpu.memory_space<vmem>>, vector<8x32xf32>
    %c0_1 = arith.constant 0 : index
    %c0_2 = arith.constant 0 : index
    %1 = vector.load %arg2[%c0_1, %c0_2] : memref<32x96xf32, #tpu.memory_space<vmem>>, vector<32x96xf32>
    %cst = arith.constant dense<0.000000e+00> : vector<8x96xf32>
    %2 = tpu.matmul %0, %1, %cst {dimension_numbers = #tpu.dot_dimension_numbers<[1], [0], [0], [1], [0, 0, 1, 1], [], []>} : vector<8x32xf32>, vector<32x96xf32>, vector<8x96xf32> -> vector<8x96xf32>
    %c0_3 = arith.constant 0 : index
    %c0_4 = arith.constant 0 : index
    %3 = vector.load %arg3[%c0_3, %c0_4] : memref<8x96xf32, #tpu.memory_space<vmem>>, vector<8x96xf32>
    tpu.vector_store %arg3[%c0_3, %c0_4], %2 {strides = array<i32>} : memref<8x96xf32, #tpu.memory_space<vmem>>, vector<8x96xf32>,
    return
  }
  func.func @transform_0(%arg0: i32) -> (i32, i32) {
    %c0_i32 = arith.constant 0 : i32
    %c0_i32_0 = arith.constant 0 : i32
    return %arg0, %c0_i32 : i32, i32
  }
  func.func @transform_1(%arg0: i32) -> (i32, i32) {
    %c0_i32 = arith.constant 0 : i32
    %c0_i32_0 = arith.constant 0 : i32
    %c0_i32_1 = arith.constant 0 : i32
    return %c0_i32, %c0_i32_0 : i32, i32
  }
  func.func @transform_2(%arg0: i32) -> (i32, i32) {
    %c0_i32 = arith.constant 0 : i32
    %c0_i32_0 = arith.constant 0 : i32
    return %arg0, %c0_i32 : i32, i32
  }
}

</mosaic_0001>

<bundles_post_ra>
// kernel: tpu_custom_call.1
= control target key start
LH: loop header
LB: loop body
LE: loop exit
PB: predicated region body
PF: predicated region fallthrough
CT: control target
= control target key end

     0   :  { %7 = vsyncpa [#allocation3], 0  ;;  %s204_s0 = inlined_call_operand.hbm [shape: f32[8,32], index: 0, kind: input, shape index: {}]   ;;  %s205_s1 = inlined_call_operand.hbm [shape: f32[32,96], index: 1, kind: input, shape index: {}]   ;;  %s206_s2 = inlined_call_operand.hbm [shape: f32[8,96], index: 2, kind: output, shape index: {}]  }
   0x1   :  { %8 = vsyncpa [#allocation6], 0 }
   0x2   :  { %9 = vsyncpa [#allocation4], 0  ;;  %s15_s11 = sshll.u32 %s204_s0, 4  ;;  %s175_s12 = smov [#allocation2]   ;;  %s16_s11 = int_to_ptr.hbm [resolvable:$true] %s15_s11 }
   0x3   :  { %s17_s13 = sshll.u32 %s175_s12, 4  ;;  %s25_s16 = sshll.u32 %s205_s1, 4  ;;  %s18_s13 = int_to_ptr.vmem [resolvable:$true] %s17_s13  ;;  %s26_s16 = int_to_ptr.hbm [resolvable:$true] %s25_s16 }
   0x4   :  { %20 = dma.hbm_to_vmem [thread:$0]  %s16_s11, 128, %s18_s13, [#allocation3]  }
   0x5   :  { %s176_s17 = smov [#allocation5]   ;;  %s177_s19 = smov 128  }
   0x6   :  { %s27_s18 = sshll.u32 %s176_s17, 4  ;;  %s178_s20 = smov 8   ;;  %s28_s18 = int_to_ptr.vmem [resolvable:$true] %s27_s18 }
   0x7   :  { %33 = dma.hbm_to_vmem [thread:$0]  %s26_s16, 512, %s28_s18, [#allocation6], %s177_s19, %s177_s19, %s178_s20  }
   0x8   :  { %169 = dma.done.wait [#allocation3], 128  }
   0x9   :  { %170 = vsyncadd [#allocation3], 4294967168 }
   0xa   :  { %171 = dma.done.wait [#allocation6], 512  }
   0xb   :  { %172 = vsyncadd [#allocation6], 4294966784  ;;  %v46_v0 = vld [vmem:[#allocation5 + $0x18] sm:$0xff]  ;;  %v45_v1 = vld [vmem:[#allocation5 + $0x10] sm:$0xff]  ;;  %vm47_vm0 = vcmask 261120   ;;  %s179_s0 = smov [#allocation7]  }
   0xc   :  { %63 = vmatpush.msra.mxu0 %v46_v0  ;;  %v44_v2 = vld [vmem:[#allocation5 + $0x8] sm:$0xff]  ;;  %v43_v3 = vld [vmem:[#allocation5] sm:$0xff]  ;;  %v42_v4 = vld [vmem:[#allocation2] sm:$0xff]  ;;  %s78_s1 = sshll.u32 %s179_s0, 4  ;;  %s80_s23 = sshll.u32 %s206_s2, 4  ;;  %vm71_vm1 = vcmask 785408   ;;  %s79_s1 = int_to_ptr.vmem [resolvable:$true] %s78_s1  ;;  %s81_s23 = int_to_ptr.hbm [resolvable:$true] %s80_s23 }
   0xe   :  { %64 = vmatpush.msra.mxu0 %v45_v1 }
  0x10   :  { %65 = vmatpush.msra.mxu0 %v44_v2 }
  0x12   :  { %66 = vmatpush.msra.mxu0 %v43_v3 }
  0x13   :  { %91 = vmatmul.msk.f32.vlgmr.msra.gmra.mxu0 %vm47_vm0, %v42_v4 }
  0x90   :  { %v68_v5 = vpop.f32.mrf.mxu0 }
  0x91   :  { %72 = vst.msk [vmem:[#allocation7] sm:$0xff] %vm71_vm1, %v68_v5 }
  0x92   :  { %83 = dma.vmem_to_hbm [thread:$0]  %s79_s1, 128, %s81_s23, [#allocation4]  }
  0x93   :  { %173 = dma.done.wait [#allocation4], 128  }
  0x94   :  { %174 = vsyncadd [#allocation4], 4294967168 }
  0x95   :  { %88 = vsyncpa [#allocation3], 1 }
  0x96   :  { %89 = vsyncpa [#allocation6], 1 }
  0x97   :  { %90 = vsyncpa [#allocation4], 1 }

</bundles_post_ra>
